<compile_context>
chip_gen: v7x
topology: tpu7x:2x2x1
jax: 0.10.0
libtpu: 0.0.40
codegen_flags: <defaults>
</compile_context>

<pallas_src>
import jax
import jax.numpy as jnp
from jax import lax
from jax.experimental import pallas as pl
from jax.experimental.pallas import tpu as pltpu


_NEG_BIG = -1e30  # Python float literal -> inlined, NOT a captured device const


def _round_up(x: int, m: int) -> int:
    return ((x + m - 1) // m) * m


def _make_kernel(c_valid: int, class_block: int, needs_class_mask: bool):
    """Build the per-tile kernel (static config baked in via closure)."""

    def kernel(logits_ref, targets_ref, out_ref, m_scr, s_scr, t_scr):
        # Grid: (row_tile i [parallel], class_block j [arbitrary, innermost]).
        j = pl.program_id(1)
        num_j = pl.num_programs(1)

        @pl.when(j == 0)
        def _():
            m_scr[...] = jnp.full_like(m_scr, _NEG_BIG)   # running row max
            s_scr[...] = jnp.zeros_like(s_scr)            # running sum of exp
            t_scr[...] = jnp.zeros_like(t_scr)            # gathered target logit

        x = logits_ref[...].astype(jnp.float32)           # (TN, CB)
        tn, cb = x.shape
        # Block-local column indices; the j*cb shift lives on the scalar side.
        col = jax.lax.broadcasted_iota(jnp.int32, (tn, cb), 1)

        if needs_class_mask:
            # Only the last class block is ragged: mask columns >= C there.
            c_local = c_valid - j * class_block            # scalar
            x = lax.cond(
                j == num_j - 1,
                lambda xv: jnp.where(col < c_local, xv, _NEG_BIG),
                lambda xv: xv,
                x)

        # Online log-sum-exp update for this class block.
        blk_max = jnp.max(x, axis=1, keepdims=True)        # (TN, 1)
        m_prev = m_scr[...]
        m_new = jnp.maximum(m_prev, blk_max)
        s_scr[...] = s_scr[...] * jnp.exp(m_prev - m_new) + jnp.sum(
            jnp.exp(x - m_new), axis=1, keepdims=True)
        m_scr[...] = m_new

        # One-hot gather of the target logit (block-local comparison; the
        # target lives in exactly one class block, so the cross-block sum
        # picks it up exactly once).
        tgt_local = targets_ref[...] - j * class_block     # (TN, 1) int32
        t_scr[...] = t_scr[...] + jnp.sum(
            jnp.where(col == tgt_local, x, 0.0), axis=1, keepdims=True)

        @pl.when(j == num_j - 1)
        def _():
            # -log p(target) per row = lse - target_logit.
            out_ref[...] = (m_scr[...] + jnp.log(s_scr[...])) - t_scr[...]

    return kernel


def perplexity_loss(logits: jax.Array, targets: jax.Array, *,
                    tile_n: int | None = None,
                    class_block: int | None = None) -> jax.Array:
    """Pallas TPU equivalent of PerplexityLoss.forward.

    logits:  (N, C) float array (f32 or bf16)
    targets: (N,)   integer array of class indices
    returns: scalar f32 perplexity
    """
    n, c = logits.shape
    itemsize = jnp.dtype(logits.dtype).itemsize

    # ---- generation-aware VMEM budget ----
    try:
        info = pltpu.get_tpu_info()
        vmem_cap = int(getattr(info, "vmem_capacity_bytes", 64 * 1024 * 1024))
    except Exception:  # interpret / non-TPU fallback: assume the smallest (v7x)
        vmem_cap = 64 * 1024 * 1024
    per_buffer_budget = vmem_cap // 6         # double-buffered logits ~ 1/3 VMEM
    vmem_limit = (vmem_cap * 3) // 4

    # ---- choose class block (lane axis) ----
    max_cb = 2048
    if class_block is None:
        class_block = c if c <= max_cb else max_cb
    if class_block >= c:
        class_block = c                       # single block == full class dim
    else:
        class_block = max(128, (class_block // 128) * 128)
    num_cb = pl.cdiv(c, class_block)
    needs_class_mask = (c % class_block) != 0

    # ---- choose row tile (sublane axis) ----
    if tile_n is None:
        tn = per_buffer_budget // (class_block * itemsize)
        tn = int(max(8, min(4096, tn)))
    else:
        tn = int(tile_n)
    tn = max(8, (tn // 8) * 8)
    tn = min(tn, _round_up(n, 8))
    num_rt = pl.cdiv(n, tn)

    # ---- no input padding: partial edge blocks handle ragged N and C ----
    targets2d = targets.astype(jnp.int32).reshape(n, 1)

    kernel = _make_kernel(c, class_block, needs_class_mask)

    nll = pl.pallas_call(
        kernel,
        out_shape=jax.ShapeDtypeStruct((n, 1), jnp.float32),
        grid_spec=pltpu.PrefetchScalarGridSpec(
            num_scalar_prefetch=0,
            grid=(num_rt, num_cb),
            in_specs=[
                pl.BlockSpec((tn, class_block), lambda i, j: (i, j)),
                pl.BlockSpec((tn, 1), lambda i, j: (i, 0)),
            ],
            out_specs=pl.BlockSpec((tn, 1), lambda i, j: (i, 0)),
            scratch_shapes=[
                pltpu.VMEM((tn, 1), jnp.float32),   # running max
                pltpu.VMEM((tn, 1), jnp.float32),   # running sum-exp
                pltpu.VMEM((tn, 1), jnp.float32),   # gathered target logit
            ],
        ),
        compiler_params=pltpu.CompilerParams(
            dimension_semantics=("parallel", "arbitrary"),
            vmem_limit_bytes=int(vmem_limit),
        ),
    )(logits, targets2d)

    # Finalize in the wrapper: mean over true N, then exp.
    entropy = jnp.sum(nll[:, 0]) / jnp.float32(n)
    return jnp.exp(entropy)


def _reference(logits, targets):
    log_probs = jax.nn.log_softmax(logits.astype(jnp.float32), axis=1)
    tgt_lp = jnp.take_along_axis(log_probs, targets[:, None].astype(jnp.int32), axis=1)
    entropy = -jnp.mean(tgt_lp)
    return jnp.exp(entropy)


if __name__ == "__main__":
    key = jax.random.PRNGKey(0)
    k1, k2, k3, k4 = jax.random.split(key, 4)

    # Small shapes consistent with the module: batch=16, num_classes=32.
    N, C = 16, 32
    logits = jax.random.normal(k1, (N, C), dtype=jnp.float32)
    targets = jax.random.randint(k2, (N,), 0, C, dtype=jnp.int32)

    ppl = perplexity_loss(logits, targets)
    jax.block_until_ready(ppl)
    ref = _reference(logits, targets)
    assert jnp.allclose(ppl, ref, rtol=1e-5, atol=1e-5), (ppl, ref)

    # Second (still small) check exercising ragged row blocks, class blocking,
    # the last-block-only class mask, and the online-LSE carry.
    N2, C2 = 50, 300
    logits2 = jax.random.normal(k3, (N2, C2), dtype=jnp.float32)
    targets2 = jax.random.randint(k4, (N2,), 0, C2, dtype=jnp.int32)
    ppl2 = perplexity_loss(logits2, targets2, tile_n=16, class_block=128)
    jax.block_until_ready(ppl2)
    ref2 = _reference(logits2, targets2)
    assert jnp.allclose(ppl2, ref2, rtol=1e-5, atol=1e-5), (ppl2, ref2)

    print("KERNEL_OK")
</pallas_src>

<mosaic_0001>
module attributes {stable_mosaic.version = 11 : i64} {
  func.func @kernel(%arg0: i32, %arg1: i32, %arg2: memref<16x32xf32, #tpu.memory_space<vmem>>, %arg3: memref<16x1xi32, #tpu.memory_space<vmem>>, %arg4: memref<16x1xf32, #tpu.memory_space<vmem>>, %arg5: memref<16x1xf32, #tpu.memory_space<vmem>>, %arg6: memref<16x1xf32, #tpu.memory_space<vmem>>, %arg7: memref<16x1xf32, #tpu.memory_space<vmem>>) attributes {dimension_semantics = [#tpu.dimension_semantics<parallel>, #tpu.dimension_semantics<arbitrary>], iteration_bounds = array<i64: 1, 1>, scalar_prefetch = 0 : i64, scratch_operands = 3 : i64, tpu.core_type = #tpu.core_type<tc>, window_params = [{transform_indices = @transform_0, window_bounds = array<i64: 16, 32>}, {transform_indices = @transform_1, window_bounds = array<i64: 16, 1>}, {transform_indices = @transform_2, window_bounds = array<i64: 16, 1>}]} {
    %c0_i32 = arith.constant 0 : i32
    %0 = arith.cmpi eq, %arg1, %c0_i32 : i32
    %1 = arith.extui %0 : i1 to i32
    %c0_i32_0 = arith.constant 0 : i32
    %2 = arith.cmpi ne, %1, %c0_i32_0 : i32
    scf.if %2 {
      %cst_21 = arith.constant -1.000000e+30 : f32
      %37 = vector.broadcast %cst_21 : f32 to vector<16x1xf32>
      %c0_22 = arith.constant 0 : index
      %c0_23 = arith.constant 0 : index
      %38 = vector.load %arg5[%c0_22, %c0_23] : memref<16x1xf32, #tpu.memory_space<vmem>>, vector<16x1xf32>
      tpu.vector_store %arg5[%c0_22, %c0_23], %37 {strides = array<i32>} : memref<16x1xf32, #tpu.memory_space<vmem>>, vector<16x1xf32>,
      %cst_24 = arith.constant 0.000000e+00 : f32
      %39 = vector.broadcast %cst_24 : f32 to vector<16x1xf32>
      %c0_25 = arith.constant 0 : index
      %c0_26 = arith.constant 0 : index
      %40 = vector.load %arg6[%c0_25, %c0_26] : memref<16x1xf32, #tpu.memory_space<vmem>>, vector<16x1xf32>
      tpu.vector_store %arg6[%c0_25, %c0_26], %39 {strides = array<i32>} : memref<16x1xf32, #tpu.memory_space<vmem>>, vector<16x1xf32>,
      %cst_27 = arith.constant 0.000000e+00 : f32
      %41 = vector.broadcast %cst_27 : f32 to vector<16x1xf32>
      %c0_28 = arith.constant 0 : index
      %c0_29 = arith.constant 0 : index
      %42 = vector.load %arg7[%c0_28, %c0_29] : memref<16x1xf32, #tpu.memory_space<vmem>>, vector<16x1xf32>
      tpu.vector_store %arg7[%c0_28, %c0_29], %41 {strides = array<i32>} : memref<16x1xf32, #tpu.memory_space<vmem>>, vector<16x1xf32>,
    } else {
    }
    %c0 = arith.constant 0 : index
    %c0_1 = arith.constant 0 : index
    %3 = vector.load %arg2[%c0, %c0_1] : memref<16x32xf32, #tpu.memory_space<vmem>>, vector<16x32xf32>
    %4 = tpu.iota {dimensions = array<i32: 1>} : vector<16x32xi32>
    %cst = arith.constant dense<0xFF800000> : vector<16xf32>
    %5 = vector.multi_reduction <maximumf>, %3, %cst [1] : vector<16x32xf32> to vector<16xf32>
    %6 = vector.shape_cast %5 : vector<16xf32> to vector<16x1xf32>
    %c0_2 = arith.constant 0 : index
    %c0_3 = arith.constant 0 : index
    %7 = vector.load %arg5[%c0_2, %c0_3] : memref<16x1xf32, #tpu.memory_space<vmem>>, vector<16x1xf32>
    %8 = arith.maximumf %7, %6 : vector<16x1xf32>
    %c0_4 = arith.constant 0 : index
    %c0_5 = arith.constant 0 : index
    %9 = vector.load %arg6[%c0_4, %c0_5] : memref<16x1xf32, #tpu.memory_space<vmem>>, vector<16x1xf32>
    %10 = arith.subf %7, %8 : vector<16x1xf32>
    %11 = math.exp %10 : vector<16x1xf32>
    %12 = arith.mulf %9, %11 : vector<16x1xf32>
    %13 = vector.broadcast %8 : vector<16x1xf32> to vector<16x32xf32>
    %14 = arith.subf %3, %13 : vector<16x32xf32>
    %15 = math.exp %14 : vector<16x32xf32>
    %cst_6 = arith.constant dense<0.000000e+00> : vector<16xf32>
    %16 = vector.multi_reduction <add>, %15, %cst_6 [1] : vector<16x32xf32> to vector<16xf32>
    %17 = vector.shape_cast %16 : vector<16xf32> to vector<16x1xf32>
    %18 = arith.addf %12, %17 : vector<16x1xf32>
    %c0_7 = arith.constant 0 : index
    %c0_8 = arith.constant 0 : index
    %19 = vector.load %arg6[%c0_7, %c0_8] : memref<16x1xf32, #tpu.memory_space<vmem>>, vector<16x1xf32>
    tpu.vector_store %arg6[%c0_7, %c0_8], %18 {strides = array<i32>} : memref<16x1xf32, #tpu.memory_space<vmem>>, vector<16x1xf32>,
    %c0_9 = arith.constant 0 : index
    %c0_10 = arith.constant 0 : index
    %20 = vector.load %arg5[%c0_9, %c0_10] : memref<16x1xf32, #tpu.memory_space<vmem>>, vector<16x1xf32>
    tpu.vector_store %arg5[%c0_9, %c0_10], %8 {strides = array<i32>} : memref<16x1xf32, #tpu.memory_space<vmem>>, vector<16x1xf32>,
    %c0_11 = arith.constant 0 : index
    %c0_12 = arith.constant 0 : index
    %21 = vector.load %arg3[%c0_11, %c0_12] : memref<16x1xi32, #tpu.memory_space<vmem>>, vector<16x1xi32>
    %c32_i32 = arith.constant 32 : i32
    %22 = arith.muli %arg1, %c32_i32 : i32
    %23 = vector.broadcast %22 : i32 to vector<16x1xi32>
    %24 = arith.subi %21, %23 : vector<16x1xi32>
    %c0_13 = arith.constant 0 : index
    %c0_14 = arith.constant 0 : index
    %25 = vector.load %arg7[%c0_13, %c0_14] : memref<16x1xf32, #tpu.memory_space<vmem>>, vector<16x1xf32>
    %26 = vector.broadcast %24 : vector<16x1xi32> to vector<16x32xi32>
    %27 = arith.cmpi eq, %4, %26 : vector<16x32xi32>
    %cst_15 = arith.constant 0.000000e+00 : f32
    %28 = vector.broadcast %cst_15 : f32 to vector<16x32xf32>
    %29 = arith.select %27, %3, %28 : vector<16x32xi1>, vector<16x32xf32>
    %cst_16 = arith.constant dense<0.000000e+00> : vector<16xf32>
    %30 = vector.multi_reduction <add>, %29, %cst_16 [1] : vector<16x32xf32> to vector<16xf32>
    %31 = vector.shape_cast %30 : vector<16xf32> to vector<16x1xf32>
    %32 = arith.addf %25, %31 : vector<16x1xf32>
    %c0_17 = arith.constant 0 : index
    %c0_18 = arith.constant 0 : index
    %33 = vector.load %arg7[%c0_17, %c0_18] : memref<16x1xf32, #tpu.memory_space<vmem>>, vector<16x1xf32>
    tpu.vector_store %arg7[%c0_17, %c0_18], %32 {strides = array<i32>} : memref<16x1xf32, #tpu.memory_space<vmem>>, vector<16x1xf32>,
    %c0_i32_19 = arith.constant 0 : i32
    %34 = arith.cmpi eq, %arg1, %c0_i32_19 : i32
    %35 = arith.extui %34 : i1 to i32
    %c0_i32_20 = arith.constant 0 : i32
    %36 = arith.cmpi ne, %35, %c0_i32_20 : i32
    scf.if %36 {
      %c0_21 = arith.constant 0 : index
      %c0_22 = arith.constant 0 : index
      %37 = vector.load %arg5[%c0_21, %c0_22] : memref<16x1xf32, #tpu.memory_space<vmem>>, vector<16x1xf32>
      %c0_23 = arith.constant 0 : index
      %c0_24 = arith.constant 0 : index
      %38 = vector.load %arg6[%c0_23, %c0_24] : memref<16x1xf32, #tpu.memory_space<vmem>>, vector<16x1xf32>
      %39 = math.log %38 : vector<16x1xf32>
      %40 = arith.addf %37, %39 : vector<16x1xf32>
      %c0_25 = arith.constant 0 : index
      %c0_26 = arith.constant 0 : index
      %41 = vector.load %arg7[%c0_25, %c0_26] : memref<16x1xf32, #tpu.memory_space<vmem>>, vector<16x1xf32>
      %42 = arith.subf %40, %41 : vector<16x1xf32>
      %c0_27 = arith.constant 0 : index
      %c0_28 = arith.constant 0 : index
      %43 = vector.load %arg4[%c0_27, %c0_28] : memref<16x1xf32, #tpu.memory_space<vmem>>, vector<16x1xf32>
      tpu.vector_store %arg4[%c0_27, %c0_28], %42 {strides = array<i32>} : memref<16x1xf32, #tpu.memory_space<vmem>>, vector<16x1xf32>,
    } else {
    }
    return
  }
  func.func @transform_0(%arg0: i32, %arg1: i32) -> (i32, i32) {
    %c0_i32 = arith.constant 0 : i32
    return %arg0, %arg1 : i32, i32
  }
  func.func @transform_1(%arg0: i32, %arg1: i32) -> (i32, i32) {
    %c0_i32 = arith.constant 0 : i32
    %c0_i32_0 = arith.constant 0 : i32
    return %arg0, %c0_i32 : i32, i32
  }
  func.func @transform_2(%arg0: i32, %arg1: i32) -> (i32, i32) {
    %c0_i32 = arith.constant 0 : i32
    %c0_i32_0 = arith.constant 0 : i32
    return %arg0, %c0_i32 : i32, i32
  }
}

</mosaic_0001>

<bundles_post_ra>
// kernel: tpu_custom_call.1
= control target key start
LH: loop header
LB: loop body
LE: loop exit
PB: predicated region body
PF: predicated region fallthrough
CT: control target
= control target key end

     0   :  { %vm26_vm0 = vcmask 261120   ;;  %vm15_vm1 = vcmask 7168   ;;  %v144_v2 = vmov -1e+30   ;;  %v145_v5 = vmov 0   ;;  %s200_s0 = inlined_call_operand.vmem [shape: f32[16,32], index: 0, kind: input, shape index: {}]   ;;  %s201_s1 = inlined_call_operand.vmem [shape: s32[16,1], index: 1, kind: input, shape index: {}]   ;;  %s202_s2 = inlined_call_operand.vmem [shape: f32[16,1], index: 2, kind: output, shape index: {}]  }
   0x1   :  { %v22_v0 = vld [vmem:[%s200_s0] sm:$0xff]  ;;  %v23_v1 = vld [vmem:[%s200_s0 + $0x8] sm:$0xff]  ;;  %16 = vst.msk [vmem:[#allocation2] sm:$0xff] %vm15_vm1, %v144_v2  ;;  %17 = vst.msk [vmem:[#allocation2 + $0x8] sm:$0xff] %vm15_vm1, %v144_v2  ;;  %130 = vset.pattern.permute.xlu1 %v145_v5  ;;  %131 = vset.pattern.permute.xlu0 %v145_v5  ;;  %v146_v6 = vmov 0.0   ;;  %v24_v17 = vlaneseq }
   0x2   :  { %v27_v3 = vsel %vm26_vm0, %v22_v0, -inf  ;;  %v30_v4 = vsel %vm26_vm0, %v23_v1, -inf  ;;  %18 = vst.msk [vmem:[#allocation3] sm:$0xff] %vm15_vm1, %v146_v6  ;;  %19 = vst.msk [vmem:[#allocation3 + $0x8] sm:$0xff] %vm15_vm1, %v146_v6  ;;  %v76_v7 = vld [vmem:[%s201_s1] sm:$0xff]  ;;  %v77_v16 = vld [vmem:[%s201_s1 + $0x8] sm:$0xff] }
   0x3   :  { %28 = vmax.xlane.f32.xlu0 %v27_v3  ;;  %20 = vst.msk [vmem:[#allocation4] sm:$0xff] %vm15_vm1, %v146_v6  ;;  %21 = vst.msk [vmem:[#allocation4 + $0x8] sm:$0xff] %vm15_vm1, %v146_v6  ;;  %v25_v18 = vand.u32 127, %v24_v17 }
   0x7   :  { %31 = vmax.xlane.f32.xlu0 %v30_v4 }
   0x8   :  { %v33_v8 = vld [vmem:[#allocation2] sm:$0xff]  ;;  %v34_v11 = vld [vmem:[#allocation2 + $0x8] sm:$0xff] }
   0x9   :  { %v37_v41 = vld [vmem:[#allocation3] sm:$0xff]  ;;  %v38_v45 = vld [vmem:[#allocation3 + $0x8] sm:$0xff] }
   0xa   :  { %v82_v35 = vld [vmem:[#allocation4] sm:$0xff]  ;;  %v83_v50 = vld [vmem:[#allocation4 + $0x8] sm:$0xff] }
  0x1d   :  { %85 = vperm.xlu0 %131, %v76_v7  }
  0x90   :  { %v29_v9 = vpop.xlane.xlu0 %28 }
  0x91   :  { %v35_v10 = vmax.f32 %v33_v8, %v29_v9 }
  0x93   :  { %v39_v12 = vsub.f32 %v33_v8, %v35_v10  ;;  %74 = vst.msk [vmem:[#allocation2] sm:$0xff] %vm15_vm1, %v35_v10  ;;  %49 = vperm.xlu1 %130, %v35_v10  }
  0x94   :  { %v32_v13 = vpop.xlane.xlu0 %31 }
  0x95   :  { %v36_v14 = vmax.f32 %v34_v11, %v32_v13  ;;  %v41_v38 = vmul.f32 1.442695, %v39_v12 }
  0x97   :  { %v40_v15 = vsub.f32 %v34_v11, %v36_v14  ;;  %75 = vst.msk [vmem:[#allocation2 + $0x8] sm:$0xff] %vm15_vm1, %v36_v14  ;;  %54 = vperm.xlu1 %130, %v36_v14  }
  0x99   :  { %v43_v39 = vmul.f32 1.442695, %v40_v15 }
  0x9a   :  { %v107_v57 = vld [vmem:[#allocation2] sm:$0xff] }
  0x9b   :  { %88 = vperm.xlu1 %130, %v77_v16  }
  0x9c   :  { %v86_v19 = vpop.permute.xlu0 %85 }
  0x9d   :  { %vm90_vm2 = vcmp.eq.s32.totalorder %v25_v18, %v86_v19 }
  0x9e   :  { %v92_v20 = vsel %vm90_vm2, %v22_v0, 0.0  ;;  %v108_v63 = vld [vmem:[#allocation2 + $0x8] sm:$0xff] }
  0x9f   :  { %v94_v21 = vsel %vm26_vm0, %v92_v20, 0.0 }
  0xa0   :  { %95 = vadd.xlane.f32.xlu0 %v94_v21 }
 0x112   :  { %v50_v22 = vpop.permute.xlu1 %49 }
 0x113   :  { %v57_v23 = vsub.f32 %v22_v0, %v50_v22 }
 0x115   :  { %v59_v24 = vmul.f32 1.442695, %v57_v23 }
 0x116   :  { %v55_v25 = vpop.permute.xlu1 %54 }
 0x117   :  { %132 = vpow2.f32 %v59_v24  ;;  %v58_v26 = vsub.f32 %v23_v1, %v55_v25 }
 0x119   :  { %v61_v27 = vmul.f32 1.442695, %v58_v26 }
 0x11a   :  { %v89_v29 = vpop.permute.xlu1 %88 }
 0x11b   :  { %134 = vpow2.f32 %v61_v27  ;;  %vm91_vm3 = vcmp.eq.s32.totalorder %v25_v18, %v89_v29 }
 0x11c   :  { %v93_v33 = vsel %vm91_vm3, %v23_v1, 0.0  ;;  %136 = vpow2.f32 %v41_v38 }
 0x11d   :  { %v97_v34 = vsel %vm26_vm0, %v93_v33, 0.0  ;;  %138 = vpow2.f32 %v43_v39 }
 0x121   :  { %v133_v28 = vpop.eup %132 }
 0x122   :  { %v63_v30 = vsel %vm26_vm0, %v133_v28, 0.0 }
 0x123   :  { %64 = vadd.xlane.f32.xlu1 %v63_v30 }
 0x125   :  { %v135_v31 = vpop.eup %134 }
 0x126   :  { %v66_v32 = vsel %vm26_vm0, %v135_v31, 0.0  ;;  %v137_v40 = vpop.eup %136 }
 0x127   :  { %67 = vadd.xlane.f32.xlu1 %v66_v32  ;;  %v45_v42 = vmul.f32 %v137_v40, %v37_v41  ;;  %v139_v43 = vpop.eup %138 }
 0x128   :  { %v46_v47 = vmul.f32 %v139_v43, %v38_v45 }
 0x12b   :  { %98 = vadd.xlane.f32.xlu1 %v97_v34 }
 0x12d   :  { %v96_v36 = vpop.xlane.xlu0 %95 }
 0x12e   :  { %v100_v37 = vadd.f32 %v96_v36, %v82_v35 }
 0x130   :  { %102 = vst.msk [vmem:[#allocation4] sm:$0xff] %vm15_vm1, %v100_v37 }
 0x137   :  { %v117_v58 = vld [vmem:[#allocation4] sm:$0xff] }
 0x1b0   :  { %v65_v44 = vpop.xlane.xlu1 %64 }
 0x1b1   :  { %v69_v46 = vadd.f32 %v65_v44, %v45_v42 }
 0x1b3   :  { %72 = vst.msk [vmem:[#allocation3] sm:$0xff] %vm15_vm1, %v69_v46 }
 0x1b4   :  { %v68_v48 = vpop.xlane.xlu1 %67 }
 0x1b5   :  { %v70_v49 = vadd.f32 %v68_v48, %v46_v47 }
 0x1b7   :  { %73 = vst.msk [vmem:[#allocation3 + $0x8] sm:$0xff] %vm15_vm1, %v70_v49 }
 0x1b8   :  { %v99_v51 = vpop.xlane.xlu1 %98 }
 0x1b9   :  { %v101_v52 = vadd.f32 %v99_v51, %v83_v50 }
 0x1ba   :  { %v109_v53 = vld [vmem:[#allocation3] sm:$0xff] }
 0x1bb   :  { %140 = vlog2.f32 %v109_v53  ;;  %103 = vst.msk [vmem:[#allocation4 + $0x8] sm:$0xff] %vm15_vm1, %v101_v52 }
 0x1be   :  { %v110_v54 = vld [vmem:[#allocation3 + $0x8] sm:$0xff] }
 0x1bf   :  { %142 = vlog2.f32 %v110_v54 }
 0x1c2   :  { %v118_v1 = vld [vmem:[#allocation4 + $0x8] sm:$0xff] }
 0x1c5   :  { %v141_v55 = vpop.eup %140 }
 0x1c6   :  { %v112_v56 = vmul.f32 0.6931472, %v141_v55 }
 0x1c8   :  { %v115_v59 = vadd.f32 %v112_v56, %v107_v57 }
 0x1c9   :  { %v143_v60 = vpop.eup %142 }
 0x1ca   :  { %v114_v61 = vmul.f32 0.6931472, %v143_v60  ;;  %v119_v62 = vsub.f32 %v115_v59, %v117_v58 }
 0x1cc   :  { %v116_v0 = vadd.f32 %v114_v61, %v108_v63  ;;  %121 = vst.msk [vmem:[%s202_s2] sm:$0xff] %vm15_vm1, %v119_v62 }
 0x1ce   :  { %v120_v2 = vsub.f32 %v116_v0, %v118_v1 }
 0x1d0   :  { %122 = vst.msk [vmem:[%s202_s2 + $0x8] sm:$0xff] %vm15_vm1, %v120_v2 }

</bundles_post_ra>
